<compile_context>
chip_gen: v7x
topology: tpu7x:2x2x1
jax: 0.10.0
libtpu: 0.0.40
codegen_flags: <defaults>
</compile_context>

<pallas_src>
import functools

import jax
import jax.numpy as jnp
from jax.experimental import pallas as pl
from jax.experimental.pallas import tpu as pltpu

KH = KW = 3


def _fused_conv_matmul_kernel(v3_s, w_exp_ref, b_exp_ref, xt_ref, out_ref,
                              *, cin, cout, h, w, k_out):
    # v3_s:      SMEM (w*k_out,) flat v3 (row-major): v3_s[wi*k_out + k] = v3[wi, k]
    # w_exp_ref: VMEM (cin*KH*KW, cout*h): [j, o*h+hh] = conv_w[o, c, kh, kw], j = c*9+kh*3+kw
    # b_exp_ref: VMEM (1, cout*h):         [0, o*h+hh] = conv_b[o]
    # xt_ref:    VMEM (cin, w, h)  -- input transposed so H sits on lanes
    # out_ref:   VMEM (k_out, cout*h) -- v4 transposed/lane-dense: out[k, o*h+hh] = v4[o, hh, k]
    lanes = cout * h
    w_all = w_exp_ref[...]                                    # (27, lanes)
    b_all = b_exp_ref[...]                                    # (1, lanes)

    # Zero-pad each (w, h) channel slab to (w+2, h+2) in-register (conv halo).
    slabs = []
    for c in range(cin):
        s = xt_ref[c]                                         # (w, h)
        zrow = jnp.zeros((1, h), jnp.float32)
        s = jnp.concatenate([zrow, s, zrow], axis=0)          # (w+2, h)
        zcol = jnp.zeros((w + 2, 1), jnp.float32)
        s = jnp.concatenate([zcol, s, zcol], axis=1)          # (w+2, h+2)
        slabs.append(s)

    # Conv (cross-correlation) as 27 lane-dense VPU FMAs, vectorized over Cout.
    acc = jnp.zeros((w, lanes), jnp.float32)
    for c in range(cin):
        for kh in range(KH):
            for kw in range(KW):
                j = (c * KH + kh) * KW + kw
                xs = slabs[c][kw:kw + w, kh:kh + h]           # (w, h): x_pad[c, kh+hh, kw+wi]
                xs_t = jnp.concatenate([xs] * cout, axis=1)   # (w, cout*h) tiled over o
                acc = acc + w_all[j:j + 1, :] * xs_t
    v1t = acc + b_all                                         # v1t[wi, o*h+hh] = v1[o, hh, wi]

    # Trailing matmul v4 = v1 @ v3, done as K=w VPU FMAs (no MXU).
    rows = []
    for k in range(k_out):
        r = v3_s[k] * v1t[0:1, :]
        for wi in range(1, w):
            r = r + v3_s[wi * k_out + k] * v1t[wi:wi + 1, :]
        rows.append(r)                                        # (1, lanes)
    out_ref[...] = jnp.concatenate(rows, axis=0)              # (k_out, lanes)


def model_forward(x, conv_w, conv_b, v3):
    """Returns (v2, {'inp': v4}) like the PyTorch Model.forward."""
    n, cin, h, w = x.shape
    cout = conv_w.shape[0]
    assert v3.shape == (w, w), "torch.matmul(v1, v3) needs last dim == v3 rows"
    k_out = v3.shape[1]
    lanes = cout * h

    # Layout plumbing only (no compute hoisted into the wrapper):
    xt = jnp.transpose(x.astype(jnp.float32), (0, 1, 3, 2))          # (n, cin, w, h)
    wr = conv_w.reshape(cout, cin * KH * KW).astype(jnp.float32)     # (cout, 27)
    w_exp = jnp.repeat(wr.T, h, axis=1)                              # (27, cout*h)
    b_exp = jnp.repeat(conv_b.astype(jnp.float32), h)[None, :]       # (1, cout*h)
    v3_flat = v3.reshape(-1).astype(jnp.float32)                     # (w*k_out,)

    kernel = functools.partial(_fused_conv_matmul_kernel,
                               cin=cin, cout=cout, h=h, w=w, k_out=k_out)

    out_t = pl.pallas_call(
        kernel,
        out_shape=jax.ShapeDtypeStruct((n, k_out, lanes), jnp.float32),
        grid=(n,),
        in_specs=[
            pl.BlockSpec(memory_space=pltpu.MemorySpace.SMEM),          # v3 scalars
            pl.BlockSpec((cin * KH * KW, lanes), lambda ni: (0, 0)),    # expanded conv weights
            pl.BlockSpec((1, lanes), lambda ni: (0, 0)),                # expanded bias
            pl.BlockSpec((None, cin, w, h), lambda ni: (ni, 0, 0, 0)),  # transposed input
        ],
        out_specs=pl.BlockSpec((None, k_out, lanes), lambda ni: (ni, 0, 0)),
        compiler_params=pltpu.CompilerParams(
            dimension_semantics=("arbitrary",)),
    )(v3_flat, w_exp, b_exp, xt)

    v2 = (n, cout, h, w)                                     # v1.size() — static
    v4 = jnp.transpose(out_t.reshape(n, k_out, cout, h), (0, 2, 3, 1))  # (n, cout, h, k_out)
    return v2, {"inp": v4}


def _reference(x, conv_w, conv_b, v3):
    v1 = jax.lax.conv_general_dilated(
        x.astype(jnp.float32), conv_w.astype(jnp.float32),
        window_strides=(1, 1), padding=((1, 1), (1, 1)),
        dimension_numbers=("NCHW", "OIHW", "NCHW"))
    v1 = v1 + conv_b[None, :, None, None]
    v4 = jnp.einsum("nohw,wk->nohk", v1, v3.astype(jnp.float32))
    return v1, v4


if __name__ == "__main__":
    key = jax.random.PRNGKey(0)
    k1, k2, k3, k4 = jax.random.split(key, 4)

    # Small shapes consistent with the forward (width must be 3 for the matmul).
    N, CIN, H, W = 1, 3, 16, 3
    COUT = 8

    x = jax.random.normal(k1, (N, CIN, H, W), dtype=jnp.float32)

    # Deterministic Conv2d(3, 8, 3) parameters (Kaiming-uniform-like bounds).
    fan_in = CIN * KH * KW
    bound = 1.0 / (fan_in ** 0.5)
    conv_w = jax.random.uniform(k2, (COUT, CIN, KH, KW), jnp.float32,
                                minval=-bound, maxval=bound)
    conv_b = jax.random.uniform(k3, (COUT,), jnp.float32,
                                minval=-bound, maxval=bound)

    # v3 = torch.FloatTensor(3, 3).uniform_(-0.5, 1.0) (deterministic here).
    # TODO(synk): the original module re-samples v3 on every forward; here it is a fixed input.
    v3 = jax.random.uniform(k4, (W, W), jnp.float32, minval=-0.5, maxval=1.0)

    v2, out = model_forward(x, conv_w, conv_b, v3)
    v4 = out["inp"]
    jax.block_until_ready(v4)

    ref_v1, ref_v4 = _reference(x, conv_w, conv_b, v3)
    assert v2 == tuple(ref_v1.shape), (v2, ref_v1.shape)
    assert jnp.allclose(v4, ref_v4, atol=1e-4, rtol=1e-4), "mismatch vs reference"

    print("KERNEL_OK")
</pallas_src>

<mosaic_0001>
module attributes {stable_mosaic.version = 11 : i64} {
  func.func @_fused_conv_matmul_kernel(%arg0: i32, %arg1: memref<9xf32, #tpu.memory_space<smem>>, %arg2: memref<27x128xf32, #tpu.memory_space<vmem>>, %arg3: memref<1x128xf32, #tpu.memory_space<vmem>>, %arg4: memref<1x3x3x16xf32, #tpu.memory_space<vmem>>, %arg5: memref<1x3x128xf32, #tpu.memory_space<vmem>>) attributes {dimension_semantics = [#tpu.dimension_semantics<arbitrary>], iteration_bounds = array<i64: 1>, scalar_prefetch = 0 : i64, scratch_operands = 0 : i64, tpu.core_type = #tpu.core_type<tc>, window_params = [{transform_indices = @transform_0, window_bounds = array<i64: 9>}, {pipeline_mode = #tpu.pipeline_mode<synchronous>, transform_indices = @transform_1, window_bounds = array<i64: 27, 128>}, {pipeline_mode = #tpu.pipeline_mode<synchronous>, transform_indices = @transform_2, window_bounds = array<i64: 1, 128>}, {transform_indices = @transform_3, window_bounds = array<i64: 1, 3, 3, 16>}, {transform_indices = @transform_4, window_bounds = array<i64: 1, 3, 128>}]} {
    %c0 = arith.constant 0 : index
    %c0_0 = arith.constant 0 : index
    %0 = vector.load %arg2[%c0, %c0_0] : memref<27x128xf32, #tpu.memory_space<vmem>>, vector<27x128xf32>
    %c0_1 = arith.constant 0 : index
    %c0_2 = arith.constant 0 : index
    %1 = vector.load %arg3[%c0_1, %c0_2] : memref<1x128xf32, #tpu.memory_space<vmem>>, vector<1x128xf32>
    %c0_3 = arith.constant 0 : index
    %c0_4 = arith.constant 0 : index
    %c0_5 = arith.constant 0 : index
    %c0_6 = arith.constant 0 : index
    %2 = vector.load %arg4[%c0_3, %c0_4, %c0_5, %c0_6] : memref<1x3x3x16xf32, #tpu.memory_space<vmem>>, vector<1x1x3x16xf32>
    %3 = vector.shape_cast %2 : vector<1x1x3x16xf32> to vector<3x16xf32>
    %cst = arith.constant 0.000000e+00 : f32
    %4 = vector.broadcast %cst : f32 to vector<1x16xf32>
    %5 = tpu.concatenate %4, %3, %4 in 0 : vector<1x16xf32>, vector<3x16xf32>, vector<1x16xf32> -> vector<5x16xf32>
    %cst_7 = arith.constant 0.000000e+00 : f32
    %6 = vector.broadcast %cst_7 : f32 to vector<5x1xf32>
    %7 = tpu.concatenate %6, %5, %6 in 1 : vector<5x1xf32>, vector<5x16xf32>, vector<5x1xf32> -> vector<5x18xf32>
    %c0_8 = arith.constant 0 : index
    %c1 = arith.constant 1 : index
    %c0_9 = arith.constant 0 : index
    %c0_10 = arith.constant 0 : index
    %8 = vector.load %arg4[%c0_8, %c1, %c0_9, %c0_10] : memref<1x3x3x16xf32, #tpu.memory_space<vmem>>, vector<1x1x3x16xf32>
    %9 = vector.shape_cast %8 : vector<1x1x3x16xf32> to vector<3x16xf32>
    %cst_11 = arith.constant 0.000000e+00 : f32
    %10 = vector.broadcast %cst_11 : f32 to vector<1x16xf32>
    %11 = tpu.concatenate %10, %9, %10 in 0 : vector<1x16xf32>, vector<3x16xf32>, vector<1x16xf32> -> vector<5x16xf32>
    %cst_12 = arith.constant 0.000000e+00 : f32
    %12 = vector.broadcast %cst_12 : f32 to vector<5x1xf32>
    %13 = tpu.concatenate %12, %11, %12 in 1 : vector<5x1xf32>, vector<5x16xf32>, vector<5x1xf32> -> vector<5x18xf32>
    %c0_13 = arith.constant 0 : index
    %c2 = arith.constant 2 : index
    %c0_14 = arith.constant 0 : index
    %c0_15 = arith.constant 0 : index
    %14 = vector.load %arg4[%c0_13, %c2, %c0_14, %c0_15] : memref<1x3x3x16xf32, #tpu.memory_space<vmem>>, vector<1x1x3x16xf32>
    %15 = vector.shape_cast %14 : vector<1x1x3x16xf32> to vector<3x16xf32>
    %cst_16 = arith.constant 0.000000e+00 : f32
    %16 = vector.broadcast %cst_16 : f32 to vector<1x16xf32>
    %17 = tpu.concatenate %16, %15, %16 in 0 : vector<1x16xf32>, vector<3x16xf32>, vector<1x16xf32> -> vector<5x16xf32>
    %cst_17 = arith.constant 0.000000e+00 : f32
    %18 = vector.broadcast %cst_17 : f32 to vector<5x1xf32>
    %19 = tpu.concatenate %18, %17, %18 in 1 : vector<5x1xf32>, vector<5x16xf32>, vector<5x1xf32> -> vector<5x18xf32>
    %cst_18 = arith.constant 0.000000e+00 : f32
    %20 = vector.broadcast %cst_18 : f32 to vector<3x128xf32>
    %21 = vector.extract_strided_slice %7 {offsets = [0, 0], sizes = [3, 16], strides = [1, 1]} : vector<5x18xf32> to vector<3x16xf32>
    %22 = tpu.concatenate %21, %21, %21, %21, %21, %21, %21, %21 in 1 : vector<3x16xf32>, vector<3x16xf32>, vector<3x16xf32>, vector<3x16xf32>, vector<3x16xf32>, vector<3x16xf32>, vector<3x16xf32>, vector<3x16xf32> -> vector<3x128xf32>
    %23 = vector.extract_strided_slice %0 {offsets = [0, 0], sizes = [1, 128], strides = [1, 1]} : vector<27x128xf32> to vector<1x128xf32>
    %24 = vector.broadcast %23 : vector<1x128xf32> to vector<3x128xf32>
    %25 = arith.mulf %24, %22 : vector<3x128xf32>
    %26 = arith.addf %20, %25 : vector<3x128xf32>
    %27 = vector.extract_strided_slice %7 {offsets = [1, 0], sizes = [3, 16], strides = [1, 1]} : vector<5x18xf32> to vector<3x16xf32>
    %28 = tpu.concatenate %27, %27, %27, %27, %27, %27, %27, %27 in 1 : vector<3x16xf32>, vector<3x16xf32>, vector<3x16xf32>, vector<3x16xf32>, vector<3x16xf32>, vector<3x16xf32>, vector<3x16xf32>, vector<3x16xf32> -> vector<3x128xf32>
    %29 = vector.extract_strided_slice %0 {offsets = [1, 0], sizes = [1, 128], strides = [1, 1]} : vector<27x128xf32> to vector<1x128xf32>
    %30 = vector.broadcast %29 : vector<1x128xf32> to vector<3x128xf32>
    %31 = arith.mulf %30, %28 : vector<3x128xf32>
    %32 = arith.addf %26, %31 : vector<3x128xf32>
    %33 = vector.extract_strided_slice %7 {offsets = [2, 0], sizes = [3, 16], strides = [1, 1]} : vector<5x18xf32> to vector<3x16xf32>
    %34 = tpu.concatenate %33, %33, %33, %33, %33, %33, %33, %33 in 1 : vector<3x16xf32>, vector<3x16xf32>, vector<3x16xf32>, vector<3x16xf32>, vector<3x16xf32>, vector<3x16xf32>, vector<3x16xf32>, vector<3x16xf32> -> vector<3x128xf32>
    %35 = vector.extract_strided_slice %0 {offsets = [2, 0], sizes = [1, 128], strides = [1, 1]} : vector<27x128xf32> to vector<1x128xf32>
    %36 = vector.broadcast %35 : vector<1x128xf32> to vector<3x128xf32>
    %37 = arith.mulf %36, %34 : vector<3x128xf32>
    %38 = arith.addf %32, %37 : vector<3x128xf32>
    %39 = vector.extract_strided_slice %7 {offsets = [0, 1], sizes = [3, 16], strides = [1, 1]} : vector<5x18xf32> to vector<3x16xf32>
    %40 = tpu.concatenate %39, %39, %39, %39, %39, %39, %39, %39 in 1 : vector<3x16xf32>, vector<3x16xf32>, vector<3x16xf32>, vector<3x16xf32>, vector<3x16xf32>, vector<3x16xf32>, vector<3x16xf32>, vector<3x16xf32> -> vector<3x128xf32>
    %41 = vector.extract_strided_slice %0 {offsets = [3, 0], sizes = [1, 128], strides = [1, 1]} : vector<27x128xf32> to vector<1x128xf32>
    %42 = vector.broadcast %41 : vector<1x128xf32> to vector<3x128xf32>
    %43 = arith.mulf %42, %40 : vector<3x128xf32>
    %44 = arith.addf %38, %43 : vector<3x128xf32>
    %45 = vector.extract_strided_slice %7 {offsets = [1, 1], sizes = [3, 16], strides = [1, 1]} : vector<5x18xf32> to vector<3x16xf32>
    %46 = tpu.concatenate %45, %45, %45, %45, %45, %45, %45, %45 in 1 : vector<3x16xf32>, vector<3x16xf32>, vector<3x16xf32>, vector<3x16xf32>, vector<3x16xf32>, vector<3x16xf32>, vector<3x16xf32>, vector<3x16xf32> -> vector<3x128xf32>
    %47 = vector.extract_strided_slice %0 {offsets = [4, 0], sizes = [1, 128], strides = [1, 1]} : vector<27x128xf32> to vector<1x128xf32>
    %48 = vector.broadcast %47 : vector<1x128xf32> to vector<3x128xf32>
    %49 = arith.mulf %48, %46 : vector<3x128xf32>
    %50 = arith.addf %44, %49 : vector<3x128xf32>
    %51 = vector.extract_strided_slice %7 {offsets = [2, 1], sizes = [3, 16], strides = [1, 1]} : vector<5x18xf32> to vector<3x16xf32>
    %52 = tpu.concatenate %51, %51, %51, %51, %51, %51, %51, %51 in 1 : vector<3x16xf32>, vector<3x16xf32>, vector<3x16xf32>, vector<3x16xf32>, vector<3x16xf32>, vector<3x16xf32>, vector<3x16xf32>, vector<3x16xf32> -> vector<3x128xf32>
    %53 = vector.extract_strided_slice %0 {offsets = [5, 0], sizes = [1, 128], strides = [1, 1]} : vector<27x128xf32> to vector<1x128xf32>
    %54 = vector.broadcast %53 : vector<1x128xf32> to vector<3x128xf32>
    %55 = arith.mulf %54, %52 : vector<3x128xf32>
    %56 = arith.addf %50, %55 : vector<3x128xf32>
    %57 = vector.extract_strided_slice %7 {offsets = [0, 2], sizes = [3, 16], strides = [1, 1]} : vector<5x18xf32> to vector<3x16xf32>
    %58 = tpu.concatenate %57, %57, %57, %57, %57, %57, %57, %57 in 1 : vector<3x16xf32>, vector<3x16xf32>, vector<3x16xf32>, vector<3x16xf32>, vector<3x16xf32>, vector<3x16xf32>, vector<3x16xf32>, vector<3x16xf32> -> vector<3x128xf32>
    %59 = vector.extract_strided_slice %0 {offsets = [6, 0], sizes = [1, 128], strides = [1, 1]} : vector<27x128xf32> to vector<1x128xf32>
    %60 = vector.broadcast %59 : vector<1x128xf32> to vector<3x128xf32>
    %61 = arith.mulf %60, %58 : vector<3x128xf32>
    %62 = arith.addf %56, %61 : vector<3x128xf32>
    %63 = vector.extract_strided_slice %7 {offsets = [1, 2], sizes = [3, 16], strides = [1, 1]} : vector<5x18xf32> to vector<3x16xf32>
    %64 = tpu.concatenate %63, %63, %63, %63, %63, %63, %63, %63 in 1 : vector<3x16xf32>, vector<3x16xf32>, vector<3x16xf32>, vector<3x16xf32>, vector<3x16xf32>, vector<3x16xf32>, vector<3x16xf32>, vector<3x16xf32> -> vector<3x128xf32>
    %65 = vector.extract_strided_slice %0 {offsets = [7, 0], sizes = [1, 128], strides = [1, 1]} : vector<27x128xf32> to vector<1x128xf32>
    %66 = vector.broadcast %65 : vector<1x128xf32> to vector<3x128xf32>
    %67 = arith.mulf %66, %64 : vector<3x128xf32>
    %68 = arith.addf %62, %67 : vector<3x128xf32>
    %69 = vector.extract_strided_slice %7 {offsets = [2, 2], sizes = [3, 16], strides = [1, 1]} : vector<5x18xf32> to vector<3x16xf32>
    %70 = tpu.concatenate %69, %69, %69, %69, %69, %69, %69, %69 in 1 : vector<3x16xf32>, vector<3x16xf32>, vector<3x16xf32>, vector<3x16xf32>, vector<3x16xf32>, vector<3x16xf32>, vector<3x16xf32>, vector<3x16xf32> -> vector<3x128xf32>
    %71 = vector.extract_strided_slice %0 {offsets = [8, 0], sizes = [1, 128], strides = [1, 1]} : vector<27x128xf32> to vector<1x128xf32>
    %72 = vector.broadcast %71 : vector<1x128xf32> to vector<3x128xf32>
    %73 = arith.mulf %72, %70 : vector<3x128xf32>
    %74 = arith.addf %68, %73 : vector<3x128xf32>
    %75 = vector.extract_strided_slice %13 {offsets = [0, 0], sizes = [3, 16], strides = [1, 1]} : vector<5x18xf32> to vector<3x16xf32>
    %76 = tpu.concatenate %75, %75, %75, %75, %75, %75, %75, %75 in 1 : vector<3x16xf32>, vector<3x16xf32>, vector<3x16xf32>, vector<3x16xf32>, vector<3x16xf32>, vector<3x16xf32>, vector<3x16xf32>, vector<3x16xf32> -> vector<3x128xf32>
    %77 = vector.extract_strided_slice %0 {offsets = [9, 0], sizes = [1, 128], strides = [1, 1]} : vector<27x128xf32> to vector<1x128xf32>
    %78 = vector.broadcast %77 : vector<1x128xf32> to vector<3x128xf32>
    %79 = arith.mulf %78, %76 : vector<3x128xf32>
    %80 = arith.addf %74, %79 : vector<3x128xf32>
    %81 = vector.extract_strided_slice %13 {offsets = [1, 0], sizes = [3, 16], strides = [1, 1]} : vector<5x18xf32> to vector<3x16xf32>
    %82 = tpu.concatenate %81, %81, %81, %81, %81, %81, %81, %81 in 1 : vector<3x16xf32>, vector<3x16xf32>, vector<3x16xf32>, vector<3x16xf32>, vector<3x16xf32>, vector<3x16xf32>, vector<3x16xf32>, vector<3x16xf32> -> vector<3x128xf32>
    %83 = vector.extract_strided_slice %0 {offsets = [10, 0], sizes = [1, 128], strides = [1, 1]} : vector<27x128xf32> to vector<1x128xf32>
    %84 = vector.broadcast %83 : vector<1x128xf32> to vector<3x128xf32>
    %85 = arith.mulf %84, %82 : vector<3x128xf32>
    %86 = arith.addf %80, %85 : vector<3x128xf32>
    %87 = vector.extract_strided_slice %13 {offsets = [2, 0], sizes = [3, 16], strides = [1, 1]} : vector<5x18xf32> to vector<3x16xf32>
    %88 = tpu.concatenate %87, %87, %87, %87, %87, %87, %87, %87 in 1 : vector<3x16xf32>, vector<3x16xf32>, vector<3x16xf32>, vector<3x16xf32>, vector<3x16xf32>, vector<3x16xf32>, vector<3x16xf32>, vector<3x16xf32> -> vector<3x128xf32>
    %89 = vector.extract_strided_slice %0 {offsets = [11, 0], sizes = [1, 128], strides = [1, 1]} : vector<27x128xf32> to vector<1x128xf32>
    %90 = vector.broadcast %89 : vector<1x128xf32> to vector<3x128xf32>
    %91 = arith.mulf %90, %88 : vector<3x128xf32>
    %92 = arith.addf %86, %91 : vector<3x128xf32>
    %93 = vector.extract_strided_slice %13 {offsets = [0, 1], sizes = [3, 16], strides = [1, 1]} : vector<5x18xf32> to vector<3x16xf32>
    %94 = tpu.concatenate %93, %93, %93, %93, %93, %93, %93, %93 in 1 : vector<3x16xf32>, vector<3x16xf32>, vector<3x16xf32>, vector<3x16xf32>, vector<3x16xf32>, vector<3x16xf32>, vector<3x16xf32>, vector<3x16xf32> -> vector<3x128xf32>
    %95 = vector.extract_strided_slice %0 {offsets = [12, 0], sizes = [1, 128], strides = [1, 1]} : vector<27x128xf32> to vector<1x128xf32>
    %96 = vector.broadcast %95 : vector<1x128xf32> to vector<3x128xf32>
    %97 = arith.mulf %96, %94 : vector<3x128xf32>
    %98 = arith.addf %92, %97 : vector<3x128xf32>
    %99 = vector.extract_strided_slice %13 {offsets = [1, 1], sizes = [3, 16], strides = [1, 1]} : vector<5x18xf32> to vector<3x16xf32>
    %100 = tpu.concatenate %99, %99, %99, %99, %99, %99, %99, %99 in 1 : vector<3x16xf32>, vector<3x16xf32>, vector<3x16xf32>, vector<3x16xf32>, vector<3x16xf32>, vector<3x16xf32>, vector<3x16xf32>, vector<3x16xf32> -> vector<3x128xf32>
    %101 = vector.extract_strided_slice %0 {offsets = [13, 0], sizes = [1, 128], strides = [1, 1]} : vector<27x128xf32> to vector<1x128xf32>
    %102 = vector.broadcast %101 : vector<1x128xf32> to vector<3x128xf32>
    %103 = arith.mulf %102, %100 : vector<3x128xf32>
    %104 = arith.addf %98, %103 : vector<3x128xf32>
    %105 = vector.extract_strided_slice %13 {offsets = [2, 1], sizes = [3, 16], strides = [1, 1]} : vector<5x18xf32> to vector<3x16xf32>
    %106 = tpu.concatenate %105, %105, %105, %105, %105, %105, %105, %105 in 1 : vector<3x16xf32>, vector<3x16xf32>, vector<3x16xf32>, vector<3x16xf32>, vector<3x16xf32>, vector<3x16xf32>, vector<3x16xf32>, vector<3x16xf32> -> vector<3x128xf32>
    %107 = vector.extract_strided_slice %0 {offsets = [14, 0], sizes = [1, 128], strides = [1, 1]} : vector<27x128xf32> to vector<1x128xf32>
    %108 = vector.broadcast %107 : vector<1x128xf32> to vector<3x128xf32>
    %109 = arith.mulf %108, %106 : vector<3x128xf32>
    %110 = arith.addf %104, %109 : vector<3x128xf32>
    %111 = vector.extract_strided_slice %13 {offsets = [0, 2], sizes = [3, 16], strides = [1, 1]} : vector<5x18xf32> to vector<3x16xf32>
    %112 = tpu.concatenate %111, %111, %111, %111, %111, %111, %111, %111 in 1 : vector<3x16xf32>, vector<3x16xf32>, vector<3x16xf32>, vector<3x16xf32>, vector<3x16xf32>, vector<3x16xf32>, vector<3x16xf32>, vector<3x16xf32> -> vector<3x128xf32>
    %113 = vector.extract_strided_slice %0 {offsets = [15, 0], sizes = [1, 128], strides = [1, 1]} : vector<27x128xf32> to vector<1x128xf32>
    %114 = vector.broadcast %113 : vector<1x128xf32> to vector<3x128xf32>
    %115 = arith.mulf %114, %112 : vector<3x128xf32>
    %116 = arith.addf %110, %115 : vector<3x128xf32>
    %117 = vector.extract_strided_slice %13 {offsets = [1, 2], sizes = [3, 16], strides = [1, 1]} : vector<5x18xf32> to vector<3x16xf32>
    %118 = tpu.concatenate %117, %117, %117, %117, %117, %117, %117, %117 in 1 : vector<3x16xf32>, vector<3x16xf32>, vector<3x16xf32>, vector<3x16xf32>, vector<3x16xf32>, vector<3x16xf32>, vector<3x16xf32>, vector<3x16xf32> -> vector<3x128xf32>
    %119 = vector.extract_strided_slice %0 {offsets = [16, 0], sizes = [1, 128], strides = [1, 1]} : vector<27x128xf32> to vector<1x128xf32>
    %120 = vector.broadcast %119 : vector<1x128xf32> to vector<3x128xf32>
    %121 = arith.mulf %120, %118 : vector<3x128xf32>
    %122 = arith.addf %116, %121 : vector<3x128xf32>
    %123 = vector.extract_strided_slice %13 {offsets = [2, 2], sizes = [3, 16], strides = [1, 1]} : vector<5x18xf32> to vector<3x16xf32>
    %124 = tpu.concatenate %123, %123, %123, %123, %123, %123, %123, %123 in 1 : vector<3x16xf32>, vector<3x16xf32>, vector<3x16xf32>, vector<3x16xf32>, vector<3x16xf32>, vector<3x16xf32>, vector<3x16xf32>, vector<3x16xf32> -> vector<3x128xf32>
    %125 = vector.extract_strided_slice %0 {offsets = [17, 0], sizes = [1, 128], strides = [1, 1]} : vector<27x128xf32> to vector<1x128xf32>
    %126 = vector.broadcast %125 : vector<1x128xf32> to vector<3x128xf32>
    %127 = arith.mulf %126, %124 : vector<3x128xf32>
    %128 = arith.addf %122, %127 : vector<3x128xf32>
    %129 = vector.extract_strided_slice %19 {offsets = [0, 0], sizes = [3, 16], strides = [1, 1]} : vector<5x18xf32> to vector<3x16xf32>
    %130 = tpu.concatenate %129, %129, %129, %129, %129, %129, %129, %129 in 1 : vector<3x16xf32>, vector<3x16xf32>, vector<3x16xf32>, vector<3x16xf32>, vector<3x16xf32>, vector<3x16xf32>, vector<3x16xf32>, vector<3x16xf32> -> vector<3x128xf32>
    %131 = vector.extract_strided_slice %0 {offsets = [18, 0], sizes = [1, 128], strides = [1, 1]} : vector<27x128xf32> to vector<1x128xf32>
    %132 = vector.broadcast %131 : vector<1x128xf32> to vector<3x128xf32>
    %133 = arith.mulf %132, %130 : vector<3x128xf32>
    %134 = arith.addf %128, %133 : vector<3x128xf32>
    %135 = vector.extract_strided_slice %19 {offsets = [1, 0], sizes = [3, 16], strides = [1, 1]} : vector<5x18xf32> to vector<3x16xf32>
    %136 = tpu.concatenate %135, %135, %135, %135, %135, %135, %135, %135 in 1 : vector<3x16xf32>, vector<3x16xf32>, vector<3x16xf32>, vector<3x16xf32>, vector<3x16xf32>, vector<3x16xf32>, vector<3x16xf32>, vector<3x16xf32> -> vector<3x128xf32>
    %137 = vector.extract_strided_slice %0 {offsets = [19, 0], sizes = [1, 128], strides = [1, 1]} : vector<27x128xf32> to vector<1x128xf32>
    %138 = vector.broadcast %137 : vector<1x128xf32> to vector<3x128xf32>
    %139 = arith.mulf %138, %136 : vector<3x128xf32>
    %140 = arith.addf %134, %139 : vector<3x128xf32>
    %141 = vector.extract_strided_slice %19 {offsets = [2, 0], sizes = [3, 16], strides = [1, 1]} : vector<5x18xf32> to vector<3x16xf32>
    %142 = tpu.concatenate %141, %141, %141, %141, %141, %141, %141, %141 in 1 : vector<3x16xf32>, vector<3x16xf32>, vector<3x16xf32>, vector<3x16xf32>, vector<3x16xf32>, vector<3x16xf32>, vector<3x16xf32>, vector<3x16xf32> -> vector<3x128xf32>
    %143 = vector.extract_strided_slice %0 {offsets = [20, 0], sizes = [1, 128], strides = [1, 1]} : vector<27x128xf32> to vector<1x128xf32>
    %144 = vector.broadcast %143 : vector<1x128xf32> to vector<3x128xf32>
    %145 = arith.mulf %144, %142 : vector<3x128xf32>
    %146 = arith.addf %140, %145 : vector<3x128xf32>
    %147 = vector.extract_strided_slice %19 {offsets = [0, 1], sizes = [3, 16], strides = [1, 1]} : vector<5x18xf32> to vector<3x16xf32>
    %148 = tpu.concatenate %147, %147, %147, %147, %147, %147, %147, %147 in 1 : vector<3x16xf32>, vector<3x16xf32>, vector<3x16xf32>, vector<3x16xf32>, vector<3x16xf32>, vector<3x16xf32>, vector<3x16xf32>, vector<3x16xf32> -> vector<3x128xf32>
    %149 = vector.extract_strided_slice %0 {offsets = [21, 0], sizes = [1, 128], strides = [1, 1]} : vector<27x128xf32> to vector<1x128xf32>
    %150 = vector.broadcast %149 : vector<1x128xf32> to vector<3x128xf32>
    %151 = arith.mulf %150, %148 : vector<3x128xf32>
    %152 = arith.addf %146, %151 : vector<3x128xf32>
    %153 = vector.extract_strided_slice %19 {offsets = [1, 1], sizes = [3, 16], strides = [1, 1]} : vector<5x18xf32> to vector<3x16xf32>
    %154 = tpu.concatenate %153, %153, %153, %153, %153, %153, %153, %153 in 1 : vector<3x16xf32>, vector<3x16xf32>, vector<3x16xf32>, vector<3x16xf32>, vector<3x16xf32>, vector<3x16xf32>, vector<3x16xf32>, vector<3x16xf32> -> vector<3x128xf32>
    %155 = vector.extract_strided_slice %0 {offsets = [22, 0], sizes = [1, 128], strides = [1, 1]} : vector<27x128xf32> to vector<1x128xf32>
    %156 = vector.broadcast %155 : vector<1x128xf32> to vector<3x128xf32>
    %157 = arith.mulf %156, %154 : vector<3x128xf32>
    %158 = arith.addf %152, %157 : vector<3x128xf32>
    %159 = vector.extract_strided_slice %19 {offsets = [2, 1], sizes = [3, 16], strides = [1, 1]} : vector<5x18xf32> to vector<3x16xf32>
    %160 = tpu.concatenate %159, %159, %159, %159, %159, %159, %159, %159 in 1 : vector<3x16xf32>, vector<3x16xf32>, vector<3x16xf32>, vector<3x16xf32>, vector<3x16xf32>, vector<3x16xf32>, vector<3x16xf32>, vector<3x16xf32> -> vector<3x128xf32>
    %161 = vector.extract_strided_slice %0 {offsets = [23, 0], sizes = [1, 128], strides = [1, 1]} : vector<27x128xf32> to vector<1x128xf32>
    %162 = vector.broadcast %161 : vector<1x128xf32> to vector<3x128xf32>
    %163 = arith.mulf %162, %160 : vector<3x128xf32>
    %164 = arith.addf %158, %163 : vector<3x128xf32>
    %165 = vector.extract_strided_slice %19 {offsets = [0, 2], sizes = [3, 16], strides = [1, 1]} : vector<5x18xf32> to vector<3x16xf32>
    %166 = tpu.concatenate %165, %165, %165, %165, %165, %165, %165, %165 in 1 : vector<3x16xf32>, vector<3x16xf32>, vector<3x16xf32>, vector<3x16xf32>, vector<3x16xf32>, vector<3x16xf32>, vector<3x16xf32>, vector<3x16xf32> -> vector<3x128xf32>
    %167 = vector.extract_strided_slice %0 {offsets = [24, 0], sizes = [1, 128], strides = [1, 1]} : vector<27x128xf32> to vector<1x128xf32>
    %168 = vector.broadcast %167 : vector<1x128xf32> to vector<3x128xf32>
    %169 = arith.mulf %168, %166 : vector<3x128xf32>
    %170 = arith.addf %164, %169 : vector<3x128xf32>
    %171 = vector.extract_strided_slice %19 {offsets = [1, 2], sizes = [3, 16], strides = [1, 1]} : vector<5x18xf32> to vector<3x16xf32>
    %172 = tpu.concatenate %171, %171, %171, %171, %171, %171, %171, %171 in 1 : vector<3x16xf32>, vector<3x16xf32>, vector<3x16xf32>, vector<3x16xf32>, vector<3x16xf32>, vector<3x16xf32>, vector<3x16xf32>, vector<3x16xf32> -> vector<3x128xf32>
    %173 = vector.extract_strided_slice %0 {offsets = [25, 0], sizes = [1, 128], strides = [1, 1]} : vector<27x128xf32> to vector<1x128xf32>
    %174 = vector.broadcast %173 : vector<1x128xf32> to vector<3x128xf32>
    %175 = arith.mulf %174, %172 : vector<3x128xf32>
    %176 = arith.addf %170, %175 : vector<3x128xf32>
    %177 = vector.extract_strided_slice %19 {offsets = [2, 2], sizes = [3, 16], strides = [1, 1]} : vector<5x18xf32> to vector<3x16xf32>
    %178 = tpu.concatenate %177, %177, %177, %177, %177, %177, %177, %177 in 1 : vector<3x16xf32>, vector<3x16xf32>, vector<3x16xf32>, vector<3x16xf32>, vector<3x16xf32>, vector<3x16xf32>, vector<3x16xf32>, vector<3x16xf32> -> vector<3x128xf32>
    %179 = vector.extract_strided_slice %0 {offsets = [26, 0], sizes = [1, 128], strides = [1, 1]} : vector<27x128xf32> to vector<1x128xf32>
    %180 = vector.broadcast %179 : vector<1x128xf32> to vector<3x128xf32>
    %181 = arith.mulf %180, %178 : vector<3x128xf32>
    %182 = arith.addf %176, %181 : vector<3x128xf32>
    %183 = vector.broadcast %1 : vector<1x128xf32> to vector<3x128xf32>
    %184 = arith.addf %182, %183 : vector<3x128xf32>
    %c0_19 = arith.constant 0 : index
    %185 = memref.load %arg1[%c0_19] : memref<9xf32, #tpu.memory_space<smem>>
    %186 = vector.extract_strided_slice %184 {offsets = [0, 0], sizes = [1, 128], strides = [1, 1]} : vector<3x128xf32> to vector<1x128xf32>
    %187 = vector.broadcast %185 : f32 to vector<1x128xf32>
    %188 = arith.mulf %187, %186 : vector<1x128xf32>
    %c3 = arith.constant 3 : index
    %189 = memref.load %arg1[%c3] : memref<9xf32, #tpu.memory_space<smem>>
    %190 = vector.extract_strided_slice %184 {offsets = [1, 0], sizes = [1, 128], strides = [1, 1]} : vector<3x128xf32> to vector<1x128xf32>
    %191 = vector.broadcast %189 : f32 to vector<1x128xf32>
    %192 = arith.mulf %191, %190 : vector<1x128xf32>
    %193 = arith.addf %188, %192 : vector<1x128xf32>
    %c6 = arith.constant 6 : index
    %194 = memref.load %arg1[%c6] : memref<9xf32, #tpu.memory_space<smem>>
    %195 = vector.extract_strided_slice %184 {offsets = [2, 0], sizes = [1, 128], strides = [1, 1]} : vector<3x128xf32> to vector<1x128xf32>
    %196 = vector.broadcast %194 : f32 to vector<1x128xf32>
    %197 = arith.mulf %196, %195 : vector<1x128xf32>
    %198 = arith.addf %193, %197 : vector<1x128xf32>
    %c1_20 = arith.constant 1 : index
    %199 = memref.load %arg1[%c1_20] : memref<9xf32, #tpu.memory_space<smem>>
    %200 = vector.extract_strided_slice %184 {offsets = [0, 0], sizes = [1, 128], strides = [1, 1]} : vector<3x128xf32> to vector<1x128xf32>
    %201 = vector.broadcast %199 : f32 to vector<1x128xf32>
    %202 = arith.mulf %201, %200 : vector<1x128xf32>
    %c4 = arith.constant 4 : index
    %203 = memref.load %arg1[%c4] : memref<9xf32, #tpu.memory_space<smem>>
    %204 = vector.extract_strided_slice %184 {offsets = [1, 0], sizes = [1, 128], strides = [1, 1]} : vector<3x128xf32> to vector<1x128xf32>
    %205 = vector.broadcast %203 : f32 to vector<1x128xf32>
    %206 = arith.mulf %205, %204 : vector<1x128xf32>
    %207 = arith.addf %202, %206 : vector<1x128xf32>
    %c7 = arith.constant 7 : index
    %208 = memref.load %arg1[%c7] : memref<9xf32, #tpu.memory_space<smem>>
    %209 = vector.extract_strided_slice %184 {offsets = [2, 0], sizes = [1, 128], strides = [1, 1]} : vector<3x128xf32> to vector<1x128xf32>
    %210 = vector.broadcast %208 : f32 to vector<1x128xf32>
    %211 = arith.mulf %210, %209 : vector<1x128xf32>
    %212 = arith.addf %207, %211 : vector<1x128xf32>
    %c2_21 = arith.constant 2 : index
    %213 = memref.load %arg1[%c2_21] : memref<9xf32, #tpu.memory_space<smem>>
    %214 = vector.extract_strided_slice %184 {offsets = [0, 0], sizes = [1, 128], strides = [1, 1]} : vector<3x128xf32> to vector<1x128xf32>
    %215 = vector.broadcast %213 : f32 to vector<1x128xf32>
    %216 = arith.mulf %215, %214 : vector<1x128xf32>
    %c5 = arith.constant 5 : index
    %217 = memref.load %arg1[%c5] : memref<9xf32, #tpu.memory_space<smem>>
    %218 = vector.extract_strided_slice %184 {offsets = [1, 0], sizes = [1, 128], strides = [1, 1]} : vector<3x128xf32> to vector<1x128xf32>
    %219 = vector.broadcast %217 : f32 to vector<1x128xf32>
    %220 = arith.mulf %219, %218 : vector<1x128xf32>
    %221 = arith.addf %216, %220 : vector<1x128xf32>
    %c8 = arith.constant 8 : index
    %222 = memref.load %arg1[%c8] : memref<9xf32, #tpu.memory_space<smem>>
    %223 = vector.extract_strided_slice %184 {offsets = [2, 0], sizes = [1, 128], strides = [1, 1]} : vector<3x128xf32> to vector<1x128xf32>
    %224 = vector.broadcast %222 : f32 to vector<1x128xf32>
    %225 = arith.mulf %224, %223 : vector<1x128xf32>
    %226 = arith.addf %221, %225 : vector<1x128xf32>
    %227 = tpu.concatenate %198, %212, %226 in 0 : vector<1x128xf32>, vector<1x128xf32>, vector<1x128xf32> -> vector<3x128xf32>
    %c0_22 = arith.constant 0 : index
    %c0_23 = arith.constant 0 : index
    %c0_24 = arith.constant 0 : index
    %228 = vector.load %arg5[%c0_22, %c0_23, %c0_24] : memref<1x3x128xf32, #tpu.memory_space<vmem>>, vector<1x3x128xf32>
    %229 = vector.shape_cast %228 : vector<1x3x128xf32> to vector<3x128xf32>
    %230 = vector.shape_cast %227 : vector<3x128xf32> to vector<1x3x128xf32>
    tpu.vector_store %arg5[%c0_22, %c0_23, %c0_24], %230 {strides = array<i32>} : memref<1x3x128xf32, #tpu.memory_space<vmem>>, vector<1x3x128xf32>,
    return
  }
  func.func @transform_0(%arg0: i32) -> i32 {
    %c0_i32 = arith.constant 0 : i32
    %c0_i32_0 = arith.constant 0 : i32
    return %c0_i32 : i32
  }
  func.func @transform_1(%arg0: i32) -> (i32, i32) {
    %c0_i32 = arith.constant 0 : i32
    %c0_i32_0 = arith.constant 0 : i32
    %c0_i32_1 = arith.constant 0 : i32
    return %c0_i32, %c0_i32_0 : i32, i32
  }
  func.func @transform_2(%arg0: i32) -> (i32, i32) {
    %c0_i32 = arith.constant 0 : i32
    %c0_i32_0 = arith.constant 0 : i32
    %c0_i32_1 = arith.constant 0 : i32
    return %c0_i32, %c0_i32_0 : i32, i32
  }
  func.func @transform_3(%arg0: i32) -> (i32, i32, i32, i32) {
    %c0_i32 = arith.constant 0 : i32
    %c0_i32_0 = arith.constant 0 : i32
    %c0_i32_1 = arith.constant 0 : i32
    %c0_i32_2 = arith.constant 0 : i32
    return %arg0, %c0_i32, %c0_i32_0, %c0_i32_1 : i32, i32, i32, i32
  }
  func.func @transform_4(%arg0: i32) -> (i32, i32, i32) {
    %c0_i32 = arith.constant 0 : i32
    %c0_i32_0 = arith.constant 0 : i32
    %c0_i32_1 = arith.constant 0 : i32
    return %arg0, %c0_i32, %c0_i32_0 : i32, i32, i32
  }
}

</mosaic_0001>

<bundles_post_ra>
// kernel: tpu_custom_call.1
= control target key start
LH: loop header
LB: loop body
LE: loop exit
PB: predicated region body
PF: predicated region fallthrough
CT: control target
= control target key end

     0   :  { %9 = vsyncpa [#allocation4], 0  ;;  %s1127_s0 = inlined_call_operand.vmem [shape: f32[9], index: 0, kind: input, shape index: {}]   ;;  %s1128_s1 = inlined_call_operand.hbm [shape: f32[27,128], index: 1, kind: input, shape index: {}]   ;;  %s1129_s2 = inlined_call_operand.vmem [shape: f32[1,128], index: 2, kind: input, shape index: {}]   ;;  %s1130_s3 = inlined_call_operand.vmem [shape: f32[1,3,3,16], index: 3, kind: input, shape index: {}]   ;;  %s1131_s4 = inlined_call_operand.vmem [shape: f32[1,3,128], index: 4, kind: output, shape index: {}]  }
   0x1   :  { %s17_s17 = sshll.u32 %s1127_s0, 4  ;;  %s18_s17 = int_to_ptr.vmem [resolvable:$true] %s17_s17 }
   0x2   :  { %10 = vsyncpa [#allocation3], 0  ;;  %s700_s18 = scalar_lea.vmem %s18_s17, 16  ;;  %p705_p1 = scmp.lt.s32.totalorder %s18_s17, %s18_s17 }
   0x3   :  { %p701_p0 = scmp.ne.s32.totalorder %s18_s17, %s700_s18  ;;  %p706_p2 = scmp.lt.s32.totalorder %s700_s18, %s700_s18 }
   0x5   :  { %p707_p3 = por %p706_p2, %p705_p1 }
   0x7   :  { %p708_p4 = pnand %p707_p3, %p701_p0 }
   0x9   :  { %711 = shalt.err (!%p708_p4)
}
   0xa   :  { %s738_s19 = smov [#allocation2]   ;;  %s739_s20 = smov [#allocation5]  }
   0xb   :  { %20 = dma.vmem_to_smem %s18_s17, 16, %s738_s19, [#allocation4]  }
   0xc   :  { %s26_s21 = sshll.u32 %s739_s20, 4  ;;  %s712_s24 = scalar_lea.hbm %s1128_s1, 512  ;;  %s27_s21 = int_to_ptr.vmem [resolvable:$true] %s26_s21 }
   0xd   :  { %p713_p5 = scmp.ne.s32.totalorder %s1128_s1, %s712_s24  ;;  %p716_p6 = scmp.lt.u32.totalorder %s712_s24, %s1128_s1 }
   0xf   :  { %p718_p7 = pnand %p716_p6, %p713_p5 }
  0x11   :  { %721 = shalt.err (!%p718_p7)
}
  0x12   :  { %s722_s28 = scalar_lea.vmem %s27_s21, 512  ;;  %p727_p9 = scmp.lt.s32.totalorder %s27_s21, %s27_s21 }
  0x13   :  { %p723_p8 = scmp.ne.s32.totalorder %s27_s21, %s722_s28  ;;  %p728_p10 = scmp.lt.s32.totalorder %s722_s28, %s722_s28 }
  0x15   :  { %p729_p11 = por %p728_p10, %p727_p9 }
  0x17   :  { %p730_p12 = pnand %p729_p11, %p723_p8 }
  0x19   :  { %733 = shalt.err (!%p730_p12)
}
  0x1a   :  { %s740_s29 = smov 128   ;;  %s741_s30 = smov 8  }
  0x1b   :  { %32 = dma.hbm_to_vmem [thread:$0]  %s1128_s1, 512, %s27_s21, [#allocation3], %s740_s29, %s740_s29, %s741_s30  }
  0x1c   :  { %734 = dma.done.wait [#allocation4], 16  }
  0x1d   :  { %735 = vsyncadd [#allocation4], 4294967280 }
  0x1e   :  { %736 = dma.done.wait [#allocation3], 512  }
  0x1f   :  { %737 = vsyncadd [#allocation3], 4294966784 }
  0x20   :  { %43 = sfence }
  0x21   :  { %v49_v0 = vld [vmem:[%s1130_s3] sm:$0x7]  ;;  %vm53_vm0 = vcmask 1040384   ;;  %vm55_vm1 = vcmask 1043456   ;;  %v661_v2 = vld [vmem:[%s1130_s3 + $0x4] sm:$0x7]  ;;  %v127_v25 = vlaneseq }
  0x22   :  { %v51_v1 = vrot.slane %v49_v0, 7  ;;  %v662_v3 = vld [vmem:[%s1130_s3 + $0x8] sm:$0x7]  ;;  %v68_v4 = vrot.slane %v661_v2, 7  ;;  %s742_s1 = smov 1   ;;  %vm61_vm2 = vcmask 7168  }
  0x23   :  { %v81_v5 = vrot.slane %v662_v3, 7  ;;  %vm63_vm3 = vcmask 138240   ;;  %s743_s3 = smov 32   ;;  %s744_s13 = smov 16   ;;  %vm113_vm4 = vcmask 130048   ;;  %vm115_vm5 = vcmask 261120  }
  0x24   :  { %v54_v6 = vsel %vm53_vm0, 0.0, %v51_v1  ;;  %v70_v8 = vsel %vm53_vm0, 0.0, %v68_v4  ;;  %s745_s14 = smov 64   ;;  %s746_s15 = smov 48   ;;  %vm117_vm6 = vcmask 392192   ;;  %vm119_vm7 = vcmask 523264  }
  0x25   :  { %v56_v7 = vsel %vm55_vm1, %v54_v6, 0.0  ;;  %v83_v9 = vsel %vm53_vm0, 0.0, %v81_v5  ;;  %v71_v11 = vsel %vm55_vm1, %v70_v8, 0.0  ;;  %s747_s16 = smov 96   ;;  %s748_s17 = smov 80   ;;  %vm121_vm8 = vcmask 654336  }
  0x26   :  { %58 = vrot.lane.b32.xlu0 %v56_v7, %s742_s1  ;;  %v84_v10 = vsel %vm55_vm1, %v83_v9, 0.0  ;;  %s749_s18 = smov 127   ;;  %s750_s19 = smov 112   ;;  %v959_v30 = vshrl.u32 %v127_v25, 7  ;;  %vm123_vm9 = vcmask 785408   ;;  %vm125_vm10 = vcmask 916480  }
  0x27   :  { %86 = vrot.lane.b32.xlu1 %v84_v10, %s742_s1  ;;  %s751_s20 = smov 31   ;;  %s752_s21 = smov 15   ;;  %v970_v36 = vld [vmem:[#allocation5] sm:$0xff]  ;;  %vm652_vm11 = vcmask 1041408  }
  0x28   :  { %s753_s22 = smov 63   ;;  %s754_s23 = smov 47   ;;  %v968_v35 = vsub.s32 1, %v959_v30  ;;  %v980_v41 = vsub.s32 0, %v959_v30  ;;  %v983_v42 = vsub.s32 2, %v959_v30  ;;  %v997_v53 = vsub.s32 3, %v959_v30 }
  0x29   :  { %s755_s24 = smov 95   ;;  %s756_s25 = smov 79   ;;  %v1003_v56 = vsub.s32 4, %v959_v30  ;;  %v1006_v57 = vsub.s32 5, %v959_v30 }
  0x2a   :  { %73 = vrot.lane.b32.xlu0 %v71_v11, %s742_s1  ;;  %s757_s0 = smov 126   ;;  %s758_s26 = smov 111   ;;  %v136_v40 = vrot.slane %v970_v36, %v968_v35  ;;  %v130_v48 = vrot.slane %v970_v36, %v980_v41  ;;  %v145_v49 = vrot.slane %v970_v36, %v983_v42  ;;  %v185_v63 = vrot.slane %v970_v36, %v997_v53 }
  0x2b   :  { %s759_s27 = smov 30   ;;  %s760_s28 = smov 14   ;;  %v191_v2 = vrot.slane %v970_v36, %v1003_v56  ;;  %v200_v3 = vrot.slane %v970_v36, %v1006_v57 }
  0x2c   :  { %s761_s29 = smov 62   ;;  %s762_s30 = smov 46  }
  0x2d   :  { %s763_s5 = smov 94   ;;  %s764_s6 = smov 78  }
  0x2e   :  { %s765_s7 = smov 110   ;;  %s1116_s8 = sld [smem:[#allocation2]] }
  0x2f   :  { %s664_s9 = sld [smem:[#allocation2 + $0x3]]  ;;  %s667_s10 = sld [smem:[#allocation2 + $0x4]] }
  0x30   :  { %s668_s11 = sld [smem:[#allocation2 + $0x7]]  ;;  %s670_s12 = sld [smem:[#allocation2 + $0x5]] }
  0x31   :  { %s665_s1 = sld [smem:[#allocation2 + $0x6]] }
  0x98   :  { %v59_v12 = vpop.permute.xlu0 %58 }
  0x99   :  { %v62_v13 = vsel %vm61_vm2, 0.0, %v59_v12  ;;  %v87_v14 = vpop.permute.xlu1 %86 }
  0x9a   :  { %v820_v15 = vsel %vm63_vm3, %v62_v13, 0.0  ;;  %v89_v16 = vsel %vm61_vm2, 0.0, %v87_v14 }
  0x9b   :  { %95 = vrot.lane.b32.xlu0 %v820_v15, %s743_s3  ;;  %92 = vrot.lane.b32.xlu1 %v820_v15, %s744_s13  ;;  %v828_v17 = vsel %vm63_vm3, %v89_v16, 0.0 }
  0x9c   :  { %v74_v18 = vpop.permute.xlu0 %73 }
  0x9d   :  { %v76_v19 = vsel %vm61_vm2, 0.0, %v74_v18 }
  0x9e   :  { %v872_v20 = vsel %vm63_vm3, %v76_v19, 0.0 }
  0x9f   :  { %101 = vrot.lane.b32.xlu0 %v820_v15, %s745_s14  ;;  %98 = vrot.lane.b32.xlu1 %v820_v15, %s746_s15 }
  0xa3   :  { %107 = vrot.lane.b32.xlu0 %v820_v15, %s747_s16  ;;  %104 = vrot.lane.b32.xlu1 %v820_v15, %s748_s17 }
  0xa7   :  { %151 = vrot.lane.b32.xlu0 %v820_v15, %s749_s18  ;;  %110 = vrot.lane.b32.xlu1 %v820_v15, %s750_s19 }
  0xab   :  { %157 = vrot.lane.b32.xlu0 %v820_v15, %s751_s20  ;;  %154 = vrot.lane.b32.xlu1 %v820_v15, %s752_s21 }
  0xaf   :  { %163 = vrot.lane.b32.xlu0 %v820_v15, %s753_s22  ;;  %160 = vrot.lane.b32.xlu1 %v820_v15, %s754_s23 }
  0xb3   :  { %169 = vrot.lane.b32.xlu0 %v820_v15, %s755_s24  ;;  %166 = vrot.lane.b32.xlu1 %v820_v15, %s756_s25 }
  0xb7   :  { %206 = vrot.lane.b32.xlu0 %v820_v15, %s757_s0  ;;  %172 = vrot.lane.b32.xlu1 %v820_v15, %s758_s26 }
  0xbb   :  { %212 = vrot.lane.b32.xlu0 %v820_v15, %s759_s27  ;;  %209 = vrot.lane.b32.xlu1 %v820_v15, %s760_s28 }
  0xbf   :  { %218 = vrot.lane.b32.xlu0 %v820_v15, %s761_s29  ;;  %215 = vrot.lane.b32.xlu1 %v820_v15, %s762_s30 }
  0xc3   :  { %224 = vrot.lane.b32.xlu0 %v820_v15, %s763_s5  ;;  %221 = vrot.lane.b32.xlu1 %v820_v15, %s764_s6 }
  0xc7   :  { %227 = vrot.lane.b32.xlu1 %v820_v15, %s765_s7  ;;  %262 = vrot.lane.b32.xlu0 %v872_v20, %s744_s13 }
  0xcb   :  { %265 = vrot.lane.b32.xlu1 %v872_v20, %s743_s3  ;;  %268 = vrot.lane.b32.xlu0 %v872_v20, %s746_s15 }
  0xcf   :  { %271 = vrot.lane.b32.xlu1 %v872_v20, %s745_s14  ;;  %274 = vrot.lane.b32.xlu0 %v872_v20, %s748_s17 }
  0xd3   :  { %277 = vrot.lane.b32.xlu1 %v872_v20, %s747_s16  ;;  %280 = vrot.lane.b32.xlu0 %v872_v20, %s750_s19 }
  0xd7   :  { %314 = vrot.lane.b32.xlu1 %v872_v20, %s749_s18  ;;  %317 = vrot.lane.b32.xlu0 %v872_v20, %s752_s21 }
  0xdb   :  { %320 = vrot.lane.b32.xlu1 %v872_v20, %s751_s20  ;;  %323 = vrot.lane.b32.xlu0 %v872_v20, %s754_s23 }
  0xdf   :  { %326 = vrot.lane.b32.xlu1 %v872_v20, %s753_s22  ;;  %329 = vrot.lane.b32.xlu0 %v872_v20, %s756_s25 }
  0xe3   :  { %332 = vrot.lane.b32.xlu1 %v872_v20, %s755_s24  ;;  %335 = vrot.lane.b32.xlu0 %v872_v20, %s758_s26 }
  0xe7   :  { %369 = vrot.lane.b32.xlu1 %v872_v20, %s757_s0  ;;  %372 = vrot.lane.b32.xlu0 %v872_v20, %s760_s28 }
  0xeb   :  { %375 = vrot.lane.b32.xlu1 %v872_v20, %s759_s27  ;;  %378 = vrot.lane.b32.xlu0 %v872_v20, %s762_s30 }
  0xef   :  { %381 = vrot.lane.b32.xlu1 %v872_v20, %s761_s29  ;;  %384 = vrot.lane.b32.xlu0 %v872_v20, %s764_s6 }
  0xf3   :  { %387 = vrot.lane.b32.xlu1 %v872_v20, %s763_s5  ;;  %390 = vrot.lane.b32.xlu0 %v872_v20, %s765_s7 }
  0xf7   :  { %425 = vrot.lane.b32.xlu1 %v828_v17, %s744_s13  ;;  %428 = vrot.lane.b32.xlu0 %v828_v17, %s743_s3  ;;  %s671_s3 = sld [smem:[#allocation2 + $0x8]]  ;;  %s666_s13 = sld [smem:[#allocation2 + $0x1]] }
  0xfb   :  { %431 = vrot.lane.b32.xlu1 %v828_v17, %s746_s15  ;;  %434 = vrot.lane.b32.xlu0 %v828_v17, %s745_s14  ;;  %s669_s14 = sld [smem:[#allocation2 + $0x2]] }
  0xff   :  { %437 = vrot.lane.b32.xlu1 %v828_v17, %s748_s17  ;;  %440 = vrot.lane.b32.xlu0 %v828_v17, %s747_s16 }
 0x103   :  { %443 = vrot.lane.b32.xlu1 %v828_v17, %s750_s19  ;;  %477 = vrot.lane.b32.xlu0 %v828_v17, %s749_s18 }
 0x107   :  { %480 = vrot.lane.b32.xlu1 %v828_v17, %s752_s21  ;;  %483 = vrot.lane.b32.xlu0 %v828_v17, %s751_s20 }
 0x10b   :  { %486 = vrot.lane.b32.xlu1 %v828_v17, %s754_s23  ;;  %489 = vrot.lane.b32.xlu0 %v828_v17, %s753_s22 }
 0x10d   :  { %v93_v21 = vpop.permute.xlu1 %92  ;;  %v96_v22 = vpop.permute.xlu0 %95 }
 0x10e   :  { %v114_v23 = vsel %vm113_vm4, %v820_v15, %v93_v21 }
 0x10f   :  { %v116_v24 = vsel %vm115_vm5, %v114_v23, %v96_v22  ;;  %492 = vrot.lane.b32.xlu1 %v828_v17, %s756_s25  ;;  %495 = vrot.lane.b32.xlu0 %v828_v17, %s755_s24 }
 0x111   :  { %v99_v26 = vpop.permute.xlu1 %98  ;;  %v102_v27 = vpop.permute.xlu0 %101 }
 0x112   :  { %v118_v28 = vsel %vm117_vm6, %v116_v24, %v99_v26 }
 0x113   :  { %v120_v29 = vsel %vm119_vm7, %v118_v28, %v102_v27  ;;  %498 = vrot.lane.b32.xlu1 %v828_v17, %s758_s26  ;;  %532 = vrot.lane.b32.xlu0 %v828_v17, %s757_s0 }
 0x115   :  { %v105_v31 = vpop.permute.xlu1 %104  ;;  %v108_v32 = vpop.permute.xlu0 %107 }
 0x116   :  { %v122_v33 = vsel %vm121_vm8, %v120_v29, %v105_v31 }
 0x117   :  { %v124_v34 = vsel %vm123_vm9, %v122_v33, %v108_v32  ;;  %535 = vrot.lane.b32.xlu1 %v828_v17, %s760_s28  ;;  %538 = vrot.lane.b32.xlu0 %v828_v17, %s759_s27 }
 0x119   :  { %v111_v37 = vpop.permute.xlu1 %110  ;;  %v152_v38 = vpop.permute.xlu0 %151 }
 0x11a   :  { %v126_v39 = vsel %vm125_vm10, %v124_v34, %v111_v37 }
 0x11b   :  { %541 = vrot.lane.b32.xlu1 %v828_v17, %s762_s30  ;;  %544 = vrot.lane.b32.xlu0 %v828_v17, %s761_s29  ;;  %v137_v46 = vmul.f32 %v136_v40, %v126_v39  ;;  %v131_v58 = vmul.f32 %v130_v48, %v126_v39  ;;  %v146_v59 = vmul.f32 %v145_v49, %v126_v39 }
 0x11d   :  { %v155_v43 = vpop.permute.xlu1 %154  ;;  %v158_v44 = vpop.permute.xlu0 %157  ;;  %v139_v54 = vrot.slane %v137_v46, 1  ;;  %v148_v4 = vrot.slane %v146_v59, 2  ;;  %v1022_v46 = vsub.s32 6, %v959_v30 }
 0x11e   :  { %v175_v45 = vsel %vm113_vm4, %v152_v38, %v155_v43 }
 0x11f   :  { %v176_v47 = vsel %vm115_vm5, %v175_v45, %v158_v44  ;;  %547 = vrot.lane.b32.xlu1 %v828_v17, %s764_s6  ;;  %550 = vrot.lane.b32.xlu0 %v828_v17, %s763_s5  ;;  %v141_v0 = vadd.f32 %v139_v54, %v131_v58  ;;  %v240_v54 = vrot.slane %v970_v36, %v1022_v46 }
 0x121   :  { %v161_v50 = vpop.permute.xlu1 %160  ;;  %v164_v51 = vpop.permute.xlu0 %163  ;;  %v150_v8 = vadd.f32 %v148_v4, %v141_v0 }
 0x122   :  { %v177_v52 = vsel %vm117_vm6, %v176_v47, %v161_v50  ;;  %v1025_v47 = vsub.s32 7, %v959_v30 }
 0x123   :  { %v178_v55 = vsel %vm119_vm7, %v177_v52, %v164_v51  ;;  %553 = vrot.lane.b32.xlu1 %v828_v17, %s765_s7 }
 0x125   :  { %v167_v60 = vpop.permute.xlu1 %166  ;;  %v170_v61 = vpop.permute.xlu0 %169 }
 0x126   :  { %v179_v62 = vsel %vm121_vm8, %v178_v55, %v167_v60  ;;  %v246_v55 = vrot.slane %v970_v36, %v1025_v47 }
 0x127   :  { %v180_v1 = vsel %vm123_vm9, %v179_v62, %v170_v61  ;;  %v1037_v61 = vld [vmem:[#allocation5 + $0x8] sm:$0xff] }
 0x129   :  { %v173_v5 = vpop.permute.xlu1 %172  ;;  %v207_v6 = vpop.permute.xlu0 %206 }
 0x12a   :  { %v181_v7 = vsel %vm125_vm10, %v180_v1, %v173_v5 }
 0x12b   :  { %v186_v9 = vmul.f32 %v185_v63, %v181_v7  ;;  %v192_v10 = vmul.f32 %v191_v2, %v181_v7  ;;  %v201_v11 = vmul.f32 %v200_v3, %v181_v7  ;;  %v255_v3 = vrot.slane %v1037_v61, %v980_v41 }
 0x12d   :  { %v187_v12 = vadd.f32 %v186_v9, %v150_v8  ;;  %v194_v13 = vrot.slane %v192_v10, 1  ;;  %v210_v14 = vpop.permute.xlu1 %209  ;;  %v213_v15 = vpop.permute.xlu0 %212  ;;  %v203_v18 = vrot.slane %v201_v11, 2  ;;  %v293_v11 = vrot.slane %v1037_v61, %v968_v35 }
 0x12e   :  { %v230_v38 = vsel %vm113_vm4, %v207_v6, %v210_v14 }
 0x12f   :  { %v196_v16 = vadd.f32 %v194_v13, %v187_v12  ;;  %v231_v39 = vsel %vm115_vm5, %v230_v38, %v213_v15  ;;  %v299_v12 = vrot.slane %v1037_v61, %v983_v42  ;;  %v348_v38 = vrot.slane %v1037_v61, %v1003_v56 }
 0x131   :  { %v205_v19 = vadd.f32 %v203_v18, %v196_v16  ;;  %v216_v21 = vpop.permute.xlu1 %215  ;;  %v219_v22 = vpop.permute.xlu0 %218 }
 0x132   :  { %v232_v44 = vsel %vm117_vm6, %v231_v39, %v216_v21  ;;  %v354_v39 = vrot.slane %v1037_v61, %v1006_v57 }
 0x133   :  { %v233_v45 = vsel %vm119_vm7, %v232_v44, %v219_v22 }
 0x135   :  { %v222_v23 = vpop.permute.xlu1 %221  ;;  %v225_v24 = vpop.permute.xlu0 %224 }
 0x136   :  { %v234_v50 = vsel %vm121_vm8, %v233_v45, %v222_v23 }
 0x137   :  { %v235_v52 = vsel %vm123_vm9, %v234_v50, %v225_v24 }
 0x139   :  { %v228_v25 = vpop.permute.xlu1 %227  ;;  %v263_v26 = vpop.permute.xlu0 %262 }
 0x13a   :  { %v283_v51 = vsel %vm113_vm4, %v872_v20, %v263_v26  ;;  %v236_v60 = vsel %vm125_vm10, %v235_v52, %v228_v25  ;;  %v308_v26 = vrot.slane %v1037_v61, %v997_v53 }
 0x13b   :  { %v241_v63 = vmul.f32 %v240_v54, %v236_v60  ;;  %v247_v20 = vmul.f32 %v246_v55, %v236_v60  ;;  %v256_v10 = vmul.f32 %v255_v3, %v236_v60  ;;  %v363_v60 = vrot.slane %v1037_v61, %v1022_v46 }
 0x13d   :  { %v266_v27 = vpop.permute.xlu1 %265  ;;  %v269_v28 = vpop.permute.xlu0 %268  ;;  %v242_v4 = vadd.f32 %v241_v63, %v205_v19  ;;  %v249_v5 = vrot.slane %v247_v20, 1  ;;  %v258_v21 = vrot.slane %v256_v10, 2  ;;  %v1070_v63 = vld [vmem:[#allocation5 + $0x10] sm:$0xff] }
 0x13e   :  { %v284_v58 = vsel %vm115_vm5, %v283_v51, %v266_v27 }
 0x13f   :  { %v285_v62 = vsel %vm117_vm6, %v284_v58, %v269_v28  ;;  %v251_v15 = vadd.f32 %v249_v5, %v242_v4  ;;  %v403_v4 = vrot.slane %v1037_v61, %v1025_v47  ;;  %v409_v5 = vrot.slane %v1070_v63, %v980_v41 }
 0x141   :  { %v272_v29 = vpop.permute.xlu1 %271  ;;  %v275_v31 = vpop.permute.xlu0 %274  ;;  %v260_v25 = vadd.f32 %v258_v21, %v251_v15  ;;  %v418_v15 = vrot.slane %v1070_v63, %v968_v35 }
 0x142   :  { %v286_v0 = vsel %vm119_vm7, %v285_v62, %v272_v29 }
 0x143   :  { %v287_v36 = vsel %vm121_vm8, %v286_v0, %v275_v31 }
 0x145   :  { %v278_v32 = vpop.permute.xlu1 %277  ;;  %v281_v33 = vpop.permute.xlu0 %280 }
 0x146   :  { %v288_v6 = vsel %vm123_vm9, %v287_v36, %v278_v32 }
 0x147   :  { %v289_v14 = vsel %vm125_vm10, %v288_v6, %v281_v33 }
 0x148   :  { %v294_v22 = vmul.f32 %v293_v11, %v289_v14  ;;  %v300_v23 = vmul.f32 %v299_v12, %v289_v14 }
 0x149   :  { %v315_v34 = vpop.permute.xlu1 %314  ;;  %v318_v37 = vpop.permute.xlu0 %317 }
 0x14a   :  { %v338_v9 = vsel %vm113_vm4, %v315_v34, %v318_v37  ;;  %v295_v31 = vadd.f32 %v294_v22, %v260_v25  ;;  %v302_v32 = vrot.slane %v300_v23, 1  ;;  %v309_v37 = vmul.f32 %v308_v26, %v289_v14 }
 0x14b   :  { %v456_v26 = vrot.slane %v1070_v63, %v983_v42 }
 0x14c   :  { %v311_v50 = vrot.slane %v309_v37, 2 }
 0x14d   :  { %v321_v40 = vpop.permute.xlu1 %320  ;;  %v324_v43 = vpop.permute.xlu0 %323 }
 0x14e   :  { %v339_v13 = vsel %vm115_vm5, %v338_v9, %v321_v40 }
 0x14f   :  { %v340_v19 = vsel %vm117_vm6, %v339_v13, %v324_v43 }
 0x151   :  { %v327_v48 = vpop.permute.xlu1 %326  ;;  %v330_v49 = vpop.permute.xlu0 %329 }
 0x152   :  { %v341_v24 = vsel %vm119_vm7, %v340_v19, %v327_v48  ;;  %v304_v48 = vadd.f32 %v302_v32, %v295_v31 }
 0x153   :  { %v342_v29 = vsel %vm121_vm8, %v341_v24, %v330_v49 }
 0x155   :  { %v333_v59 = vpop.permute.xlu1 %332  ;;  %v336_v30 = vpop.permute.xlu0 %335 }
 0x156   :  { %v343_v33 = vsel %vm123_vm9, %v342_v29, %v333_v59  ;;  %v313_v59 = vadd.f32 %v311_v50, %v304_v48 }
 0x157   :  { %v344_v45 = vsel %vm125_vm10, %v343_v33, %v336_v30 }
 0x158   :  { %v349_v51 = vmul.f32 %v348_v38, %v344_v45  ;;  %v355_v52 = vmul.f32 %v354_v39, %v344_v45  ;;  %v364_v36 = vmul.f32 %v363_v60, %v344_v45  ;;  %v471_v45 = vrot.slane %v1070_v63, %v1003_v56 }
 0x159   :  { %v370_v1 = vpop.permute.xlu1 %369  ;;  %v373_v2 = vpop.permute.xlu0 %372 }
 0x15a   :  { %v393_v34 = vsel %vm113_vm4, %v370_v1, %v373_v2  ;;  %v350_v20 = vadd.f32 %v349_v51, %v313_v59  ;;  %v357_v30 = vrot.slane %v355_v52, 1  ;;  %v366_v12 = vrot.slane %v364_v36, 2 }
 0x15b   :  { %v517_v59 = vrot.slane %v1070_v63, %v1022_v46  ;;  %v526_v36 = vrot.slane %v1070_v63, %v1025_v47 }
 0x15d   :  { %v376_v7 = vpop.permute.xlu1 %375  ;;  %v379_v8 = vpop.permute.xlu0 %378 }
 0x15e   :  { %v394_v40 = vsel %vm115_vm5, %v393_v34, %v376_v7  ;;  %v359_v7 = vadd.f32 %v357_v30, %v350_v20 }
 0x15f   :  { %v395_v49 = vsel %vm117_vm6, %v394_v40, %v379_v8 }
 0x161   :  { %v382_v16 = vpop.permute.xlu1 %381  ;;  %v385_v18 = vpop.permute.xlu0 %384 }
 0x162   :  { %v396_v54 = vsel %vm119_vm7, %v395_v49, %v382_v16 }
 0x163   :  { %v397_v62 = vsel %vm121_vm8, %v396_v54, %v385_v18 }
 0x165   :  { %v388_v27 = vpop.permute.xlu1 %387  ;;  %v391_v28 = vpop.permute.xlu0 %390 }
 0x166   :  { %v398_v0 = vsel %vm123_vm9, %v397_v62, %v388_v27  ;;  %v462_v27 = vrot.slane %v1070_v63, %v997_v53 }
 0x167   :  { %v399_v6 = vsel %vm125_vm10, %v398_v0, %v391_v28 }
 0x168   :  { %v404_v13 = vmul.f32 %v403_v4, %v399_v6  ;;  %v410_v14 = vmul.f32 %v409_v5, %v399_v6  ;;  %v419_v24 = vmul.f32 %v418_v15, %v399_v6 }
 0x169   :  { %v426_v43 = vpop.permute.xlu1 %425  ;;  %v429_v44 = vpop.permute.xlu0 %428 }
 0x16a   :  { %v446_v3 = vsel %vm113_vm4, %v828_v17, %v426_v43  ;;  %v368_v17 = vadd.f32 %v366_v12, %v359_v7  ;;  %v412_v22 = vrot.slane %v410_v14, 1  ;;  %v421_v37 = vrot.slane %v419_v24, 2 }
 0x16b   :  { %v447_v8 = vsel %vm115_vm5, %v446_v3, %v429_v44 }
 0x16c   :  { %v405_v21 = vadd.f32 %v404_v13, %v368_v17 }
 0x16d   :  { %v432_v55 = vpop.permute.xlu1 %431  ;;  %v435_v58 = vpop.permute.xlu0 %434 }
 0x16e   :  { %v448_v11 = vsel %vm117_vm6, %v447_v8, %v432_v55  ;;  %v414_v32 = vadd.f32 %v412_v22, %v405_v21  ;;  %v47_v8 = vld [vmem:[#allocation5 + $0x18] sm:$0x7] }
 0x16f   :  { %v449_v61 = vsel %vm119_vm7, %v448_v11, %v435_v58  ;;  %v511_v58 = vrot.slane %v1070_v63, %v1006_v57  ;;  %v566_v17 = vrot.slane %v47_v8, %v980_v41  ;;  %v572_v47 = vrot.slane %v47_v8, %v968_v35 }
 0x170   :  { %v423_v44 = vadd.f32 %v421_v37, %v414_v32  ;;  %v581_v63 = vrot.slane %v47_v8, %v983_v42  ;;  %v639_v37 = vstv %s671_s3 }
 0x171   :  { %v438_v1 = vpop.permute.xlu1 %437  ;;  %v441_v2 = vpop.permute.xlu0 %440 }
 0x172   :  { %v450_v19 = vsel %vm121_vm8, %v449_v61, %v438_v1 }
 0x173   :  { %v451_v25 = vsel %vm123_vm9, %v450_v19, %v441_v2 }
 0x175   :  { %v444_v9 = vpop.permute.xlu1 %443  ;;  %v478_v10 = vpop.permute.xlu0 %477 }
 0x176   :  { %v452_v31 = vsel %vm125_vm10, %v451_v25, %v444_v9  ;;  %v663_v25 = vld [vmem:[%s1129_s2] ss:$0 sm:$0xff] }
 0x177   :  { %v457_v38 = vmul.f32 %v456_v26, %v452_v31  ;;  %v463_v39 = vmul.f32 %v462_v27, %v452_v31  ;;  %v472_v54 = vmul.f32 %v471_v45, %v452_v31  ;;  %v598_v27 = vstv %s664_s9 }
 0x178   :  { %v632_v31 = vstv %s670_s12 }
 0x179   :  { %v481_v16 = vpop.permute.xlu1 %480  ;;  %v484_v18 = vpop.permute.xlu0 %483  ;;  %v458_v49 = vadd.f32 %v457_v38, %v423_v44  ;;  %v465_v50 = vrot.slane %v463_v39, 1  ;;  %v474_v0 = vrot.slane %v472_v54, 2  ;;  %v612_v38 = vstv %s666_s13 }
 0x17a   :  { %v501_v23 = vsel %vm113_vm4, %v478_v10, %v481_v16  ;;  %v629_v39 = vstv %s669_s14 }
 0x17b   :  { %v502_v33 = vsel %vm115_vm5, %v501_v23, %v484_v18  ;;  %v467_v56 = vadd.f32 %v465_v50, %v458_v49 }
 0x17d   :  { %v487_v28 = vpop.permute.xlu1 %486  ;;  %v490_v29 = vpop.permute.xlu0 %489  ;;  %v476_v3 = vadd.f32 %v474_v0, %v467_v56 }
 0x17e   :  { %v503_v34 = vsel %vm117_vm6, %v502_v33, %v487_v28  ;;  %v615_v28 = vstv %s667_s10  ;;  %v595_v33 = vstv %s1116_s8 }
 0x17f   :  { %v504_v53 = vsel %vm119_vm7, %v503_v34, %v490_v29  ;;  %v622_v29 = vstv %s668_s11  ;;  %v605_v34 = vstv %s665_s1 }
 0x181   :  { %v493_v40 = vpop.permute.xlu1 %492  ;;  %v496_v43 = vpop.permute.xlu0 %495 }
 0x182   :  { %v505_v48 = vsel %vm121_vm8, %v504_v53, %v493_v40 }
 0x183   :  { %v506_v55 = vsel %vm123_vm9, %v505_v48, %v496_v43 }
 0x185   :  { %v499_v51 = vpop.permute.xlu1 %498  ;;  %v533_v52 = vpop.permute.xlu0 %532 }
 0x186   :  { %v507_v60 = vsel %vm125_vm10, %v506_v55, %v499_v51 }
 0x187   :  { %v512_v1 = vmul.f32 %v511_v58, %v507_v60  ;;  %v518_v2 = vmul.f32 %v517_v59, %v507_v60  ;;  %v527_v9 = vmul.f32 %v526_v36, %v507_v60 }
 0x189   :  { %v536_v62 = vpop.permute.xlu1 %535  ;;  %v539_v20 = vpop.permute.xlu0 %538  ;;  %v513_v6 = vadd.f32 %v512_v1, %v476_v3  ;;  %v520_v7 = vrot.slane %v518_v2, 1  ;;  %v529_v15 = vrot.slane %v527_v9, 2 }
 0x18a   :  { %v556_v30 = vsel %vm113_vm4, %v533_v52, %v536_v62 }
 0x18b   :  { %v557_v4 = vsel %vm115_vm5, %v556_v30, %v539_v20  ;;  %v522_v14 = vadd.f32 %v520_v7, %v513_v6 }
 0x18d   :  { %v542_v57 = vpop.permute.xlu1 %541  ;;  %v545_v5 = vpop.permute.xlu0 %544  ;;  %v531_v19 = vadd.f32 %v529_v15, %v522_v14 }
 0x18e   :  { %v558_v46 = vsel %vm117_vm6, %v557_v4, %v542_v57 }
 0x18f   :  { %v559_v10 = vsel %vm119_vm7, %v558_v46, %v545_v5 }
 0x191   :  { %v548_v11 = vpop.permute.xlu1 %547  ;;  %v551_v13 = vpop.permute.xlu0 %550 }
 0x192   :  { %v560_v12 = vsel %vm121_vm8, %v559_v10, %v548_v11 }
 0x193   :  { %v561_v61 = vsel %vm123_vm9, %v560_v12, %v551_v13 }
 0x195   :  { %v554_v16 = vpop.permute.xlu1 %553 }
 0x196   :  { %v562_v18 = vsel %vm125_vm10, %v561_v61, %v554_v16 }
 0x197   :  { %v567_v21 = vmul.f32 %v566_v17, %v562_v18  ;;  %v573_v22 = vmul.f32 %v572_v47, %v562_v18  ;;  %v582_v41 = vmul.f32 %v581_v63, %v562_v18 }
 0x199   :  { %v568_v35 = vadd.f32 %v567_v21, %v531_v19  ;;  %v575_v42 = vrot.slane %v573_v22, 1  ;;  %v584_v24 = vrot.slane %v582_v41, 2 }
 0x19b   :  { %v577_v23 = vadd.f32 %v575_v42, %v568_v35 }
 0x19d   :  { %v586_v26 = vadd.f32 %v584_v24, %v577_v23 }
 0x19f   :  { %v593_v32 = vadd.f32 %v663_v25, %v586_v26 }
 0x1a1   :  { %v599_v40 = vmul.f32 %v598_v27, %v593_v32  ;;  %v616_v43 = vmul.f32 %v615_v28, %v593_v32  ;;  %v623_v44 = vmul.f32 %v622_v29, %v593_v32  ;;  %v633_v45 = vmul.f32 %v632_v31, %v593_v32 }
 0x1a2   :  { %v596_v53 = vmul.f32 %v595_v33, %v593_v32  ;;  %v606_v49 = vmul.f32 %v605_v34, %v593_v32  ;;  %v640_v50 = vmul.f32 %v639_v37, %v593_v32  ;;  %v613_v51 = vmul.f32 %v612_v38, %v593_v32 }
 0x1a3   :  { %v601_v48 = vrot.slane %v599_v40, 1  ;;  %v618_v52 = vrot.slane %v616_v43, 1  ;;  %v630_v54 = vmul.f32 %v629_v39, %v593_v32  ;;  %v635_v55 = vrot.slane %v633_v45, 1 }
 0x1a4   :  { %v625_v58 = vrot.slane %v623_v44, 2  ;;  %v642_v62 = vrot.slane %v640_v50, 2  ;;  %v608_v20 = vrot.slane %v606_v49, 2 }
 0x1a5   :  { %v603_v59 = vadd.f32 %v601_v48, %v596_v53  ;;  %v620_v60 = vadd.f32 %v618_v52, %v613_v51  ;;  %v637_v56 = vadd.f32 %v635_v55, %v630_v54 }
 0x1a7   :  { %v627_v30 = vadd.f32 %v625_v58, %v620_v60  ;;  %v644_v0 = vadd.f32 %v642_v62, %v637_v56  ;;  %v610_v1 = vadd.f32 %v608_v20, %v603_v59 }
 0x1a9   :  { %v646_v2 = vrot.slane %v627_v30, 7  ;;  %v649_v3 = vrot.slane %v644_v0, 6 }
 0x1ab   :  { %v651_v36 = vsel %vm53_vm0, %v610_v1, %v646_v2 }
 0x1ac   :  { %v653_v4 = vsel %vm652_vm11, %v651_v36, %v649_v3 }
 0x1ad   :  { %654 = vst [vmem:[%s1131_s4] sm:$0x7] %v653_v4 }
 0x1ae   :  { %659 = vsyncpa [#allocation3], 1 }
 0x1af   :  { %660 = vsyncpa [#allocation4], 1 }

</bundles_post_ra>
